<compile_context>
chip_gen: v6e
topology: v6e:2x2x1
jax: 0.10.0
libtpu: 0.0.40
codegen_flags: <defaults>
</compile_context>

<pallas_src>
import functools

import jax
import jax.numpy as jnp
from jax.experimental import pallas as pl
from jax.experimental.pallas import tpu as pltpu


_PER_BUFFER_CAP_BYTES = 2 * 1024 * 1024   # ~2 MiB live f32 tile: HBM-roofline sweet spot
_MIN_GRID_STEPS = 4                       # keep both v7x TCs + the pipeline busy


def _vmem_budgets():
    """(vmem_limit_bytes, tile_budget_bytes), generation-aware with fallback."""
    vmem_cap = None
    try:
        vmem_cap = pltpu.get_tpu_info().vmem_capacity_bytes
    except Exception:
        vmem_cap = None
    if not vmem_cap or vmem_cap <= 0:
        vmem_cap = 64 * 1024 * 1024       # conservative: v7x per-TC VMEM
    # <= 48 MiB on 128 MiB chips (v5e/v6e), <= 32 MiB on v7x (64 MiB/TC).
    vmem_limit = min(48 * 1024 * 1024, vmem_cap // 2)
    tile_budget = min(16 * 1024 * 1024, vmem_limit // 3)
    return vmem_limit, tile_budget


def _rmsnorm_kernel(x_ref, w_ref, o_ref, *, eps, inv_dim, torch_cast_compat):
    # x_ref: (tm, D) input tile, w_ref: (1, D) weight, o_ref: (tm, D) output.
    x = x_ref[...].astype(jnp.float32)                         # x.float()
    ms = jnp.sum(x * x, axis=-1, keepdims=True) * inv_dim      # mean(x^2, -1)
    inv = jax.lax.rsqrt(ms + eps)                              # rsqrt(. + eps)  (EUP)
    if torch_cast_compat:
        # Exact PyTorch order: downcast to x.dtype before the weight multiply.
        y = (x * inv).astype(x_ref.dtype)
        o_ref[...] = (y * w_ref[...]).astype(o_ref.dtype)
    else:
        # Stay in f32, single final cast (identical for f32 x; better numerics
        # and fewer VPU casts for bf16 x).
        o_ref[...] = (x * inv * w_ref[...].astype(jnp.float32)).astype(o_ref.dtype)


def _rmsnorm_kernel_noaffine(x_ref, o_ref, *, eps, inv_dim):
    x = x_ref[...].astype(jnp.float32)
    ms = jnp.sum(x * x, axis=-1, keepdims=True) * inv_dim
    o_ref[...] = (x * jax.lax.rsqrt(ms + eps)).astype(o_ref.dtype)


def _sublane_multiple(dtype):
    # Packed sublane tile: 8 for 4-byte, 16 for 2-byte, 32 for 1-byte dtypes.
    return max(8, 32 // jnp.dtype(dtype).itemsize)


def _round_up(n, m):
    return ((n + m - 1) // m) * m


def rmsnorm(x, weight, eps=1e-6, *, block_rows=None, out_dtype=None,
            torch_cast_compat=False):
    """RMSNorm over the last axis of `x`, matching the PyTorch module forward.

    x:      any shape (..., dim)
    weight: (dim,) or None (elementwise_affine=False)
    out_dtype: output dtype.  Defaults to result_type(x, weight) (PyTorch
               promotion).  For bf16 x with f32 weight, STRONGLY prefer
               passing out_dtype=x.dtype: this kernel is HBM-bound on every
               TPU generation and bf16 output cuts write traffic ~2x.
    torch_cast_compat: reproduce PyTorch's exact cast order
               (norm result .type_as(x) before the weight multiply).
    """
    orig_shape = x.shape
    dim = orig_shape[-1]
    rows = 1
    for s in orig_shape[:-1]:
        rows *= s
    x2d = x.reshape(rows, dim)

    has_weight = weight is not None
    if has_weight:
        w2d = weight.reshape(1, dim)
        promoted = jnp.result_type(x.dtype, weight.dtype)
    else:
        promoted = x.dtype
    if out_dtype is None:
        out_dtype = promoted

    in_bytes = jnp.dtype(x.dtype).itemsize
    out_bytes = jnp.dtype(out_dtype).itemsize
    sub = _sublane_multiple(x.dtype)

    vmem_limit, tile_budget = _vmem_budgets()

    if block_rows is None:
        # Working set per row: double-buffered in+out tiles plus the
        # materialized f32 copy of x and one live f32 temp.
        bytes_per_row = dim * (in_bytes + out_bytes) * 2 + dim * 4 * 2
        tm = tile_budget // bytes_per_row
        # Cap each live f32 tile at ~2 MiB: already at the HBM roofline there.
        tm_cap = _PER_BUFFER_CAP_BYTES // (dim * 4)
        tm = max(sub, min(1024, tm, tm_cap))
    else:
        tm = block_rows
    # Keep at least _MIN_GRID_STEPS grid steps when the problem is big enough
    # (v7x megacore sharding + pipeline overlap).
    if rows >= _MIN_GRID_STEPS * sub:
        tm = min(tm, _round_up(pl.cdiv(rows, _MIN_GRID_STEPS), sub))
    # Never bigger than the (sublane-rounded) problem itself.
    tm = min(tm, _round_up(rows, sub))
    tm = _round_up(tm, sub)

    grid = (pl.cdiv(rows, tm),)

    cost = pl.CostEstimate(
        flops=5 * rows * dim,
        transcendentals=rows,
        bytes_accessed=rows * dim * (in_bytes + out_bytes)
        + (dim * jnp.dtype(weight.dtype).itemsize if has_weight else 0),
    )

    x_spec = pl.BlockSpec((tm, dim), lambda i: (i, 0))
    o_spec = pl.BlockSpec((tm, dim), lambda i: (i, 0))

    if has_weight:
        kernel = functools.partial(
            _rmsnorm_kernel, eps=eps, inv_dim=1.0 / dim,
            torch_cast_compat=torch_cast_compat)
        in_specs = [x_spec, pl.BlockSpec((1, dim), lambda i: (0, 0))]
        args = (x2d, w2d)
    else:
        kernel = functools.partial(
            _rmsnorm_kernel_noaffine, eps=eps, inv_dim=1.0 / dim)
        in_specs = [x_spec]
        args = (x2d,)

    out = pl.pallas_call(
        kernel,
        out_shape=jax.ShapeDtypeStruct((rows, dim), out_dtype),
        grid_spec=pltpu.PrefetchScalarGridSpec(
            num_scalar_prefetch=0,
            grid=grid,
            in_specs=in_specs,
            out_specs=o_spec,
        ),
        compiler_params=pltpu.CompilerParams(
            dimension_semantics=("parallel",),   # shards across TCs on v7x
            vmem_limit_bytes=vmem_limit,
        ),
        cost_estimate=cost,
    )(*args)

    return out.reshape(orig_shape)


def rmsnorm_reference(x, weight, eps=1e-6):
    xf = x.astype(jnp.float32)
    inv = jax.lax.rsqrt(jnp.mean(xf * xf, axis=-1, keepdims=True) + eps)
    y = (xf * inv).astype(x.dtype)
    if weight is not None:
        y = y * weight
    return y


if __name__ == "__main__":
    key = jax.random.PRNGKey(0)
    k1, k2, k3, k4 = jax.random.split(key, 4)

    # Test 1: shapes implied by the module (batch, seq, hidden), weight = ones.
    batch, seq, hidden = 2, 8, 32
    x = jax.random.normal(k1, (batch, seq, hidden), dtype=jnp.float32)
    weight = jnp.ones((hidden,), dtype=jnp.float32)   # module init: ones(dim)

    out = jax.block_until_ready(rmsnorm(x, weight, eps=1e-6))
    ref = rmsnorm_reference(x, weight, eps=1e-6)
    assert out.shape == x.shape, (out.shape, x.shape)
    assert jnp.allclose(out, ref, atol=1e-5, rtol=1e-5), "mismatch vs reference (test 1)"

    # Test 2: row count not a multiple of the tile (exercises masked last block)
    # and a non-trivial weight, lane-dense dim=128.
    x2 = jax.random.normal(k2, (3, 5, 128), dtype=jnp.float32)
    w2 = jax.random.normal(k3, (128,), dtype=jnp.float32)
    out2 = jax.block_until_ready(rmsnorm(x2, w2, eps=1e-6))
    ref2 = rmsnorm_reference(x2, w2, eps=1e-6)
    assert out2.shape == x2.shape, (out2.shape, x2.shape)
    assert jnp.allclose(out2, ref2, atol=1e-5, rtol=1e-5), "mismatch vs reference (test 2)"

    # Test 3: elementwise_affine=False path (no weight DMA / multiply).
    x3 = jax.random.normal(k4, (4, 7, 128), dtype=jnp.float32)
    out3 = jax.block_until_ready(rmsnorm(x3, None, eps=1e-6))
    ref3 = rmsnorm_reference(x3, None, eps=1e-6)
    assert out3.shape == x3.shape, (out3.shape, x3.shape)
    assert jnp.allclose(out3, ref3, atol=1e-5, rtol=1e-5), "mismatch vs reference (test 3)"

    print("KERNEL_OK")
</pallas_src>

<mosaic_0001>
module attributes {stable_mosaic.version = 11 : i64} {
  func.func @_rmsnorm_kernel(%arg0: i32, %arg1: memref<16x32xf32, #tpu.memory_space<vmem>>, %arg2: memref<1x32xf32, #tpu.memory_space<vmem>>, %arg3: memref<16x32xf32, #tpu.memory_space<vmem>>) attributes {dimension_semantics = [#tpu.dimension_semantics<parallel>], iteration_bounds = array<i64: 1>, scalar_prefetch = 0 : i64, scratch_operands = 0 : i64, tpu.core_type = #tpu.core_type<tc>, window_params = [{transform_indices = @transform_0, window_bounds = array<i64: 16, 32>}, {pipeline_mode = #tpu.pipeline_mode<synchronous>, transform_indices = @transform_1, window_bounds = array<i64: 1, 32>}, {transform_indices = @transform_2, window_bounds = array<i64: 16, 32>}]} {
    %c0 = arith.constant 0 : index
    %c0_0 = arith.constant 0 : index
    %0 = vector.load %arg1[%c0, %c0_0] : memref<16x32xf32, #tpu.memory_space<vmem>>, vector<16x32xf32>
    %1 = arith.mulf %0, %0 : vector<16x32xf32>
    %cst = arith.constant dense<0.000000e+00> : vector<16xf32>
    %2 = vector.multi_reduction <add>, %1, %cst [1] : vector<16x32xf32> to vector<16xf32>
    %3 = vector.shape_cast %2 : vector<16xf32> to vector<16x1xf32>
    %cst_1 = arith.constant 3.125000e-02 : f32
    %4 = vector.broadcast %cst_1 : f32 to vector<16x1xf32>
    %5 = arith.mulf %3, %4 : vector<16x1xf32>
    %cst_2 = arith.constant 9.99999997E-7 : f32
    %6 = vector.broadcast %cst_2 : f32 to vector<16x1xf32>
    %7 = arith.addf %5, %6 : vector<16x1xf32>
    %8 = math.rsqrt %7 : vector<16x1xf32>
    %9 = vector.broadcast %8 : vector<16x1xf32> to vector<16x32xf32>
    %10 = arith.mulf %0, %9 : vector<16x32xf32>
    %c0_3 = arith.constant 0 : index
    %c0_4 = arith.constant 0 : index
    %11 = vector.load %arg2[%c0_3, %c0_4] : memref<1x32xf32, #tpu.memory_space<vmem>>, vector<1x32xf32>
    %12 = vector.broadcast %11 : vector<1x32xf32> to vector<16x32xf32>
    %13 = arith.mulf %10, %12 : vector<16x32xf32>
    %c0_5 = arith.constant 0 : index
    %c0_6 = arith.constant 0 : index
    %14 = vector.load %arg3[%c0_5, %c0_6] : memref<16x32xf32, #tpu.memory_space<vmem>>, vector<16x32xf32>
    tpu.vector_store %arg3[%c0_5, %c0_6], %13 {strides = array<i32>} : memref<16x32xf32, #tpu.memory_space<vmem>>, vector<16x32xf32>,
    return
  }
  func.func @transform_0(%arg0: i32) -> (i32, i32) {
    %c0_i32 = arith.constant 0 : i32
    %c0_i32_0 = arith.constant 0 : i32
    return %arg0, %c0_i32 : i32, i32
  }
  func.func @transform_1(%arg0: i32) -> (i32, i32) {
    %c0_i32 = arith.constant 0 : i32
    %c0_i32_0 = arith.constant 0 : i32
    %c0_i32_1 = arith.constant 0 : i32
    return %c0_i32, %c0_i32_0 : i32, i32
  }
  func.func @transform_2(%arg0: i32) -> (i32, i32) {
    %c0_i32 = arith.constant 0 : i32
    %c0_i32_0 = arith.constant 0 : i32
    return %arg0, %c0_i32 : i32, i32
  }
}

</mosaic_0001>

<bundles_post_ra>
// kernel: tpu_custom_call.1
= control target key start
LH: loop header
LB: loop body
LE: loop exit
PB: predicated region body
PF: predicated region fallthrough
CT: control target
= control target key end

     0   :  { %7 = vsyncpa [#allocation3], 0  ;;  %s164_s0 = inlined_call_operand.hbm [shape: f32[16,32], index: 0, kind: input, shape index: {}]   ;;  %s165_s1 = inlined_call_operand.vmem [shape: f32[1,32], index: 1, kind: input, shape index: {}]   ;;  %s166_s2 = inlined_call_operand.hbm [shape: f32[16,32], index: 2, kind: output, shape index: {}]  }
   0x1   :  { %8 = vsyncpa [#allocation4], 0  ;;  %s126_s9 = smov [#allocation2]  }
   0x2   :  { %s14_s10 = sshll.u32 %s126_s9, 4  ;;  %s15_s10 = int_to_ptr.vmem [resolvable:$true] %s14_s10 }
   0x3   :  { %s90_s11 = scalar_lea.vmem %s15_s10, 256  ;;  %p95_p1 = scmp.lt.s32.totalorder %s15_s10, %s15_s10 }
   0x4   :  { %p91_p0 = scmp.ne.s32.totalorder %s15_s10, %s90_s11  ;;  %p96_p2 = scmp.lt.s32.totalorder %s90_s11, %s90_s11 }
   0x6   :  { %p97_p3 = por %p96_p2, %p95_p1 }
   0x8   :  { %p98_p4 = pnand %p97_p3, %p91_p0 }
   0xa   :  { %101 = shalt.err (!%p98_p4)
}
   0xb   :  { %s127_s12 = smov 128   ;;  %s128_s13 = smov 8  }
   0xc   :  { %20 = dma.hbm_to_vmem [thread:$0]  %s164_s0, 256, %s15_s10, [#allocation3], %s127_s12, %s127_s12, %s128_s13  }
   0xd   :  { %122 = dma.done.wait [#allocation3], 256  }
   0xe   :  { %123 = vsyncadd [#allocation3], 4294967040  ;;  %v26_v0 = vld [vmem:[#allocation2] sm:$0xff]  ;;  %vm30_vm0 = vcmask 261120   ;;  %v27_v1 = vld [vmem:[#allocation2 + $0x8] sm:$0xff]  ;;  %s129_s17 = smov [#allocation5]  }
   0xf   :  { %v28_v2 = vmul.f32 %v26_v0, %v26_v0  ;;  %v29_v3 = vmul.f32 %v27_v1, %v27_v1  ;;  %v73_v13 = vld [vmem:[%s165_s1] ss:$0 sm:$0xff]  ;;  %s61_s18 = sshll.u32 %s129_s17, 4  ;;  %s62_s18 = int_to_ptr.vmem [resolvable:$true] %s61_s18 }
  0x10   :  { %s102_s19 = scalar_lea.vmem %s62_s18, 256  ;;  %p107_p6 = scmp.lt.s32.totalorder %s62_s18, %s62_s18 }
  0x11   :  { %v31_v4 = vsel %vm30_vm0, %v28_v2, 0.0  ;;  %v34_v5 = vsel %vm30_vm0, %v29_v3, 0.0  ;;  %p103_p5 = scmp.ne.s32.totalorder %s62_s18, %s102_s19  ;;  %p108_p7 = scmp.lt.s32.totalorder %s102_s19, %s102_s19 }
  0x12   :  { %32 = vadd.xlane.f32.xlu0 %v31_v4 }
  0x13   :  { %p109_p8 = por %p108_p7, %p107_p6 }
  0x15   :  { %p110_p9 = pnand %p109_p8, %p103_p5 }
  0x16   :  { %35 = vadd.xlane.f32.xlu0 %v34_v5 }
  0x9b   :  { %v33_v6 = vpop.xlane.xlu0 %32 }
  0x9c   :  { %v37_v7 = vmul.f32 0.03125, %v33_v6 }
  0x9e   :  { %v39_v8 = vadd.f32 1e-06, %v37_v7 }
  0x9f   :  { %v36_v9 = vpop.xlane.xlu0 %35 }
  0xa0   :  { %78 = vrsqrt.f32 %v39_v8  ;;  %v38_v10 = vmul.f32 0.03125, %v36_v9 }
  0xa2   :  { %v40_v11 = vadd.f32 1e-06, %v38_v10 }
  0xa4   :  { %80 = vrsqrt.f32 %v40_v11 }
  0xad   :  { %v79_v12 = vpop.eup %78 }
  0xae   :  { %v43_v14 = vmul.f32 %v79_v12, %v26_v0 }
  0xb0   :  { %v52_v15 = vmul.f32 %v73_v13, %v43_v14 }
  0xb1   :  { %v81_v16 = vpop.eup %80 }
  0xb2   :  { %v44_v17 = vmul.f32 %v81_v16, %v27_v1  ;;  %54 = vst.msk [vmem:[#allocation5] sm:$0xff] %vm30_vm0, %v52_v15 }
  0xb4   :  { %v53_v18 = vmul.f32 %v73_v13, %v44_v17 }
  0xb6   :  { %55 = vst.msk [vmem:[#allocation5 + $0x8] sm:$0xff] %vm30_vm0, %v53_v18 }
  0xb7   :  { %113 = shalt.err (!%p110_p9)
}
  0xb8   :  { %67 = dma.vmem_to_hbm [thread:$0]  %s62_s18, 256, %s166_s2, [#allocation4], %s127_s12, %s127_s12, %s128_s13  }
  0xb9   :  { %124 = dma.done.wait [#allocation4], 256  }
  0xba   :  { %125 = vsyncadd [#allocation4], 4294967040 }
  0xbb   :  { %71 = vsyncpa [#allocation3], 1 }
  0xbc   :  { %72 = vsyncpa [#allocation4], 1 }

</bundles_post_ra>
